<compile_context>
chip_gen: v7x
topology: tpu7x:2x2x1
jax: 0.10.0
libtpu: 0.0.40
codegen_flags: <defaults>
</compile_context>

<pallas_src>
import functools

import jax
import jax.numpy as jnp
from jax.experimental import pallas as pl
from jax.experimental.pallas import tpu as pltpu


def _vmem_budget_bytes():
    """Bytes allowed for pipelined blocks (headroom below physical VMEM)."""
    cap = 64 << 20  # conservative fallback (v7x physical VMEM per TC)
    try:
        cap = int(getattr(pltpu.get_tpu_info(), "vmem_capacity_bytes", cap))
    except Exception:
        pass
    # ~3/8 of physical: 24 MiB on v7x (64 MiB), 48 MiB on v5e/v6e (128 MiB).
    return max(min(cap * 3 // 8, 48 << 20), 8 << 20)


def _pick_tile_rows(n_rows, n_cols, itemsize, budget, tile_rows=None):
    """Row-tile size so 2 input + 2 output double-buffered (tn, C) blocks fit the budget."""
    if tile_rows is None:
        cap = max(budget // (4 * n_cols * itemsize), 8)
        tile_rows = min(1024, cap)
    tile_rows = min(tile_rows, n_rows)
    return max((tile_rows // 8) * 8, 8)


# --------------------------- fused path (x fits in VMEM) ----------------------------

def _se_fused_kernel(x_ref, w1_ref, w2_ref, o_ref, *, n_rows):
    x = x_ref[...]
    y_avg = jnp.sum(x.astype(jnp.float32), axis=0, keepdims=True) * (1.0 / n_rows)  # (1, C)
    # torch nn.Linear layout: w1 (H, C), w2 (C, H) -> transpose via dot_general dims.
    h = jax.lax.dot_general(y_avg, w1_ref[...].astype(jnp.float32),
                            (((1,), (1,)), ((), ())),
                            preferred_element_type=jnp.float32)
    h = jnp.maximum(h, 0.0)                                                          # (1, H)
    y = jax.lax.dot_general(h, w2_ref[...].astype(jnp.float32),
                            (((1,), (1,)), ((), ())),
                            preferred_element_type=jnp.float32)
    gate = jax.nn.sigmoid(y).astype(o_ref.dtype)                                     # (1, C)
    o_ref[...] = x * gate


# --------------------------- two-pass path (large N) --------------------------------

def _se_partial_sum_kernel(x_ref, psum_ref, *, n_rows, tile_rows, tiles_per_split):
    """Phase 1: per-split, sublane-aligned (8, C) partial sums of the row tiles.
    psum_ref is a resident accumulator: its block index is constant along the
    'arbitrary' grid axis (do not change that without rethinking the init/finalize)."""
    i = pl.program_id(1)

    @pl.when(i == 0)
    def _():
        psum_ref[...] = jnp.zeros_like(psum_ref)

    tile_start = (pl.program_id(0) * tiles_per_split + i) * tile_rows

    def _accum(x):
        # (tn, C) -> (tn//8, 8, C): summing over axis 0 is pure vreg adds (no XLU).
        x = x.reshape(tile_rows // 8, 8, x.shape[-1])
        psum_ref[...] += jnp.sum(x, axis=0, keepdims=True)

    @pl.when(tile_start + tile_rows <= n_rows)       # full tile: no mask ops at all
    def _():
        _accum(x_ref[...].astype(jnp.float32))

    @pl.when(tile_start + tile_rows > n_rows)        # ragged / out-of-range tile only
    def _():
        row = jax.lax.broadcasted_iota(jnp.int32, (tile_rows, 1), 0) + tile_start
        _accum(jnp.where(row < n_rows, x_ref[...].astype(jnp.float32), 0.0))


def _se_scale_kernel(gate_ref, x_ref, o_ref):
    """Phase 2: streaming scale; gate is already x.dtype -> one native-dtype mul per vreg."""
    o_ref[...] = x_ref[...] * gate_ref[...]


# ------------------------------------ wrapper ----------------------------------------

def se_layer(x, w1, w2, *, tile_rows=None, vmem_budget_bytes=None, force_two_pass=False):
    """x: (N, C); w1: (H, C) torch (out,in) layout; w2: (C, H) torch layout."""
    N, C = x.shape
    H = w1.shape[0]
    itemsize = x.dtype.itemsize
    budget = vmem_budget_bytes if vmem_budget_bytes is not None else _vmem_budget_bytes()
    vmem_limit = int(budget + (8 << 20))

    # TODO(synk): if C is not a multiple of 128 in production, pad the channel dim (and
    # slice after) so Phase-2 stores stay lane-dense; the demo uses C=128 so it is skipped.

    # ---- fused path: single call, 1x read + 1x write of x --------------------------
    fused_bytes = 4 * N * C * itemsize + 4 * N * C + 8 * H * C   # in/out dbl-buf + f32 temp + weights
    if not force_two_pass and fused_bytes <= budget:
        return pl.pallas_call(
            functools.partial(_se_fused_kernel, n_rows=N),
            out_shape=jax.ShapeDtypeStruct((N, C), x.dtype),
            grid=(1,),
            in_specs=[pl.BlockSpec((N, C), lambda i: (0, 0)),
                      pl.BlockSpec((H, C), lambda i: (0, 0)),
                      pl.BlockSpec((C, H), lambda i: (0, 0))],
            out_specs=pl.BlockSpec((N, C), lambda i: (0, 0)),
            compiler_params=pltpu.CompilerParams(
                dimension_semantics=("arbitrary",),
                vmem_limit_bytes=vmem_limit),
        )(x, w1, w2)

    # ---- two-pass path --------------------------------------------------------------
    tn = _pick_tile_rows(N, C, itemsize, budget, tile_rows)
    total_tiles = pl.cdiv(N, tn)
    n_split = 2                                   # sharded across TCs on v7x, serial elsewhere
    tiles_per_split = pl.cdiv(total_tiles, n_split)
    last_tile = total_tiles - 1

    def x_reduce_map(c, i):
        # Clamp so out-of-range tiles of the rectangular split grid stay in bounds;
        # their contribution is masked to zero inside the kernel.
        return (jnp.minimum(c * tiles_per_split + i, last_tile), 0)

    # Phase 1: per-split sublane-aligned partial sums (n_split, 8, C), f32.
    psums = pl.pallas_call(
        functools.partial(_se_partial_sum_kernel, n_rows=N, tile_rows=tn,
                          tiles_per_split=tiles_per_split),
        out_shape=jax.ShapeDtypeStruct((n_split, 8, C), jnp.float32),
        grid=(n_split, tiles_per_split),
        in_specs=[pl.BlockSpec((tn, C), x_reduce_map)],
        # Resident accumulator: output block index constant along the "arbitrary" axis.
        out_specs=pl.BlockSpec((1, 8, C), lambda c, i: (c, 0, 0)),
        compiler_params=pltpu.CompilerParams(
            dimension_semantics=("parallel", "arbitrary"),
            vmem_limit_bytes=vmem_limit),
    )(x)

    # Tiny excitation runs exactly once, outside the streaming kernels.
    y_avg = jnp.sum(psums, axis=(0, 1)) * (1.0 / N)                                  # (C,)
    h = jnp.maximum(jnp.dot(w1.astype(jnp.float32), y_avg,
                            precision=jax.lax.Precision.HIGHEST), 0.0)               # (H,)
    y = jax.nn.sigmoid(jnp.dot(w2.astype(jnp.float32), h,
                               precision=jax.lax.Precision.HIGHEST))                 # (C,)
    gate = y.astype(x.dtype).reshape(1, C)

    # Phase 2: streaming per-channel scale.
    grid_n = pl.cdiv(N, tn)
    out = pl.pallas_call(
        _se_scale_kernel,
        out_shape=jax.ShapeDtypeStruct((N, C), x.dtype),
        grid=(grid_n,),
        in_specs=[pl.BlockSpec((1, C), lambda i: (0, 0)),   # gate (tiny, resident)
                  pl.BlockSpec((tn, C), lambda i: (i, 0))], # x row tiles
        out_specs=pl.BlockSpec((tn, C), lambda i: (i, 0)),
        # NOTE: if x is dead at the call site, input_output_aliases={1: 0} halves HBM footprint.
        compiler_params=pltpu.CompilerParams(
            dimension_semantics=("parallel",),
            vmem_limit_bytes=vmem_limit),
    )(gate, x)
    return out


if __name__ == "__main__":
    def reference(x, w1, w2):
        y_avg = jnp.mean(x, axis=0, keepdims=True)
        h = jnp.maximum(jnp.dot(y_avg, w1.T, precision=jax.lax.Precision.HIGHEST), 0.0)
        y = jax.nn.sigmoid(jnp.dot(h, w2.T, precision=jax.lax.Precision.HIGHEST))
        return x * y

    reduction = 32
    C = 128
    H = C // reduction
    key = jax.random.PRNGKey(0)
    kx, k1, k2, kx2 = jax.random.split(key, 4)

    # torch nn.Linear convention: (out_features, in_features)
    w1 = jax.random.normal(k1, (H, C), dtype=jnp.float32) * (1.0 / jnp.sqrt(C))
    w2 = jax.random.normal(k2, (C, H), dtype=jnp.float32) * (1.0 / jnp.sqrt(H))

    # Case 1: fused single-call path (x fits comfortably in VMEM).
    N = 320
    x = jax.random.normal(kx, (N, C), dtype=jnp.float32)
    out = se_layer(x, w1, w2)
    jax.block_until_ready(out)
    ref = reference(x, w1, w2)
    assert jnp.allclose(out, ref, atol=1e-4, rtol=1e-4), float(jnp.max(jnp.abs(out - ref)))

    # Case 2: forced two-pass path with small tiles to exercise the 2-way split grid,
    # the ragged last tile and the clamped out-of-range tile (600 rows / 128-row tiles
    # -> 5 tiles split 3+3, last split tile fully masked).
    N2 = 600
    x2 = jax.random.normal(kx2, (N2, C), dtype=jnp.float32)
    out2 = se_layer(x2, w1, w2, tile_rows=128, force_two_pass=True)
    jax.block_until_ready(out2)
    ref2 = reference(x2, w1, w2)
    assert jnp.allclose(out2, ref2, atol=1e-4, rtol=1e-4), float(jnp.max(jnp.abs(out2 - ref2)))

    print("KERNEL_OK")
</pallas_src>

<mosaic_0001>
module attributes {stable_mosaic.version = 11 : i64} {
  func.func @_se_fused_kernel(%arg0: i32, %arg1: memref<320x128xf32, #tpu.memory_space<vmem>>, %arg2: memref<4x128xf32, #tpu.memory_space<vmem>>, %arg3: memref<128x4xf32, #tpu.memory_space<vmem>>, %arg4: memref<320x128xf32, #tpu.memory_space<vmem>>) attributes {dimension_semantics = [#tpu.dimension_semantics<arbitrary>], iteration_bounds = array<i64: 1>, scalar_prefetch = 0 : i64, scratch_operands = 0 : i64, tpu.core_type = #tpu.core_type<tc>, window_params = [{pipeline_mode = #tpu.pipeline_mode<synchronous>, transform_indices = @transform_0, window_bounds = array<i64: 320, 128>}, {pipeline_mode = #tpu.pipeline_mode<synchronous>, transform_indices = @transform_1, window_bounds = array<i64: 4, 128>}, {pipeline_mode = #tpu.pipeline_mode<synchronous>, transform_indices = @transform_2, window_bounds = array<i64: 128, 4>}, {pipeline_mode = #tpu.pipeline_mode<synchronous>, transform_indices = @transform_3, window_bounds = array<i64: 320, 128>}]} {
    %c0 = arith.constant 0 : index
    %c0_0 = arith.constant 0 : index
    %0 = vector.load %arg1[%c0, %c0_0] : memref<320x128xf32, #tpu.memory_space<vmem>>, vector<320x128xf32>
    %cst = arith.constant dense<0.000000e+00> : vector<128xf32>
    %1 = vector.multi_reduction <add>, %0, %cst [0] : vector<320x128xf32> to vector<128xf32>
    %2 = vector.shape_cast %1 : vector<128xf32> to vector<1x128xf32>
    %cst_1 = arith.constant 3.125000e-03 : f32
    %3 = vector.broadcast %cst_1 : f32 to vector<1x128xf32>
    %4 = arith.mulf %2, %3 : vector<1x128xf32>
    %c0_2 = arith.constant 0 : index
    %c0_3 = arith.constant 0 : index
    %5 = vector.load %arg2[%c0_2, %c0_3] : memref<4x128xf32, #tpu.memory_space<vmem>>, vector<4x128xf32>
    %cst_4 = arith.constant dense<0.000000e+00> : vector<1x4xf32>
    %6 = tpu.matmul %4, %5, %cst_4 {dimension_numbers = #tpu.dot_dimension_numbers<[1], [1], [0], [0], [0, 0, 1, 0], [], []>} : vector<1x128xf32>, vector<4x128xf32>, vector<1x4xf32> -> vector<1x4xf32>
    %cst_5 = arith.constant 0.000000e+00 : f32
    %7 = vector.broadcast %cst_5 : f32 to vector<1x4xf32>
    %8 = arith.maximumf %6, %7 : vector<1x4xf32>
    %c0_6 = arith.constant 0 : index
    %c0_7 = arith.constant 0 : index
    %9 = vector.load %arg3[%c0_6, %c0_7] : memref<128x4xf32, #tpu.memory_space<vmem>>, vector<128x4xf32>
    %cst_8 = arith.constant dense<0.000000e+00> : vector<1x128xf32>
    %10 = tpu.matmul %8, %9, %cst_8 {dimension_numbers = #tpu.dot_dimension_numbers<[1], [1], [0], [0], [0, 0, 1, 0], [], []>} : vector<1x4xf32>, vector<128x4xf32>, vector<1x128xf32> -> vector<1x128xf32>
    %11 = arith.negf %10 : vector<1x128xf32>
    %12 = math.exp %11 : vector<1x128xf32>
    %cst_9 = arith.constant 1.000000e+00 : f32
    %13 = vector.broadcast %cst_9 : f32 to vector<1x128xf32>
    %14 = arith.addf %13, %12 : vector<1x128xf32>
    %15 = arith.divf %13, %14 : vector<1x128xf32>
    %16 = vector.broadcast %15 : vector<1x128xf32> to vector<320x128xf32>
    %17 = arith.mulf %0, %16 : vector<320x128xf32>
    %c0_10 = arith.constant 0 : index
    %c0_11 = arith.constant 0 : index
    %18 = vector.load %arg4[%c0_10, %c0_11] : memref<320x128xf32, #tpu.memory_space<vmem>>, vector<320x128xf32>
    tpu.vector_store %arg4[%c0_10, %c0_11], %17 {strides = array<i32>} : memref<320x128xf32, #tpu.memory_space<vmem>>, vector<320x128xf32>,
    return
  }
  func.func @transform_0(%arg0: i32) -> (i32, i32) {
    %c0_i32 = arith.constant 0 : i32
    %c0_i32_0 = arith.constant 0 : i32
    %c0_i32_1 = arith.constant 0 : i32
    return %c0_i32, %c0_i32_0 : i32, i32
  }
  func.func @transform_1(%arg0: i32) -> (i32, i32) {
    %c0_i32 = arith.constant 0 : i32
    %c0_i32_0 = arith.constant 0 : i32
    %c0_i32_1 = arith.constant 0 : i32
    return %c0_i32, %c0_i32_0 : i32, i32
  }
  func.func @transform_2(%arg0: i32) -> (i32, i32) {
    %c0_i32 = arith.constant 0 : i32
    %c0_i32_0 = arith.constant 0 : i32
    %c0_i32_1 = arith.constant 0 : i32
    return %c0_i32, %c0_i32_0 : i32, i32
  }
  func.func @transform_3(%arg0: i32) -> (i32, i32) {
    %c0_i32 = arith.constant 0 : i32
    %c0_i32_0 = arith.constant 0 : i32
    %c0_i32_1 = arith.constant 0 : i32
    return %c0_i32, %c0_i32_0 : i32, i32
  }
}

</mosaic_0001>

<bundles_post_ra>
// kernel: tpu_custom_call.1
= control target key start
LH: loop header
LB: loop body
LE: loop exit
PB: predicated region body
PF: predicated region fallthrough
CT: control target
= control target key end

     0   :  { %8 = vsyncpa [#allocation3], 0  ;;  %s941_s0 = inlined_call_operand.hbm [shape: f32[320,128], index: 0, kind: input, shape index: {}]   ;;  %s942_s1 = inlined_call_operand.vmem [shape: f32[4,128], index: 1, kind: input, shape index: {}]   ;;  %s943_s2 = inlined_call_operand.vmem [shape: f32[128,4], index: 2, kind: input, shape index: {}]   ;;  %s944_s3 = inlined_call_operand.hbm [shape: f32[320,128], index: 3, kind: output, shape index: {}]  }
   0x1   :  { %9 = vsyncpa [#allocation4], 0  ;;  %s600_s12 = smov [#allocation2]   ;;  %s552_s16 = scalar_lea.hbm %s941_s0, 5120 }
   0x2   :  { %s15_s13 = sshll.u32 %s600_s12, 4  ;;  %p553_p0 = scmp.ne.s32.totalorder %s941_s0, %s552_s16  ;;  %s16_s13 = int_to_ptr.vmem [resolvable:$true] %s15_s13 }
   0x3   :  { %p556_p1 = scmp.lt.u32.totalorder %s552_s16, %s941_s0 }
   0x5   :  { %p558_p2 = pnand %p556_p1, %p553_p0 }
   0x7   :  { %561 = shalt.err (!%p558_p2)
}
   0x8   :  { %s562_s21 = scalar_lea.vmem %s16_s13, 5120  ;;  %p567_p4 = scmp.lt.s32.totalorder %s16_s13, %s16_s13 }
   0x9   :  { %p563_p3 = scmp.ne.s32.totalorder %s16_s13, %s562_s21  ;;  %p568_p5 = scmp.lt.s32.totalorder %s562_s21, %s562_s21 }
   0xb   :  { %p569_p6 = por %p568_p5, %p567_p4 }
   0xd   :  { %p570_p7 = pnand %p569_p6, %p563_p3 }
   0xf   :  { %573 = shalt.err (!%p570_p7)
}
  0x10   :  { %s601_s22 = smov 128   ;;  %s602_s23 = smov 8  }
  0x11   :  { %21 = dma.hbm_to_vmem [thread:$0]  %s941_s0, 5120, %s16_s13, [#allocation3], %s601_s22, %s601_s22, %s602_s23  }
  0x12   :  { %596 = dma.done.wait [#allocation3], 5120  }
  0x13   :  { %597 = vsyncadd [#allocation3], 4294962176  ;;  %v603_v0 = vmov 0.0   ;;  %vm604_vm0 = vmmov 0   ;;  %v605_v1 = vmov 0.0|0.0   ;;  %v646_v3 = vld [vmem:[#allocation2] sm:$0xff] }
  0x14   :  { %469 = vmatprep.subr.mxu0 %v603_v0  ;;  %471 = vmatprep.mubr.msk.f32.mxu0 %vm604_vm0, %v603_v0  ;;  %v115_v2 = vld [vmem:[%s942_s1] sm:$0xf]  ;;  %v648_v4 = vld [vmem:[#allocation2 + $0x8] sm:$0xff]  ;;  %v650_v5 = vld [vmem:[#allocation2 + $0x10] sm:$0xff]  ;;  %vm203_vm1 = vcmask 31744  }
  0x15   :  { %509 = vmatprep.subr.bf16.mxu1 %v605_v1  ;;  %506 = vmatprep.mubr.msk.f32.mxu1 %vm604_vm0, %v603_v0  ;;  %v69_v6 = vadd.f32 %v648_v4, %v646_v3  ;;  %v654_v7 = vld [vmem:[#allocation2 + $0x18] sm:$0xff]  ;;  %v657_v9 = vld [vmem:[#allocation2 + $0x20] sm:$0xff]  ;;  %v660_v11 = vld [vmem:[#allocation2 + $0x28] sm:$0xff] }
  0x16   :  { %470 = vmatpush3.xpose.msra.mxu0 %v115_v2  ;;  %v663_v13 = vld [vmem:[#allocation2 + $0x30] sm:$0xff]  ;;  %v666_v15 = vld [vmem:[#allocation2 + $0x38] sm:$0xff]  ;;  %v669_v17 = vld [vmem:[#allocation2 + $0x40] sm:$0xff] }
  0x17   :  { %v70_v8 = vadd.f32 %v69_v6, %v650_v5  ;;  %v187_v19 = vld [vmem:[%s943_s2] sm:$0xff]  ;;  %v675_v20 = vld [vmem:[#allocation2 + $0x48] sm:$0xff]  ;;  %vm682_vm2 = vmpackc.low %vm203_vm1, %vm203_vm1 }
  0x18   :  { %v188_v21 = vld [vmem:[%s943_s2 + $0x8] sm:$0xff]  ;;  %v687_v25 = vld [vmem:[#allocation2 + $0x50] sm:$0xff]  ;;  %v692_v27 = vld [vmem:[#allocation2 + $0x58] sm:$0xff] }
  0x19   :  { %v71_v10 = vadd.f32 %v70_v8, %v654_v7  ;;  %v510_v24 = vpack.c.bf16 %v188_v21, %v187_v19  ;;  %v189_v28 = vld [vmem:[%s943_s2 + $0x10] sm:$0xff]  ;;  %v190_v29 = vld [vmem:[%s943_s2 + $0x18] sm:$0xff]  ;;  %v702_v31 = vld [vmem:[#allocation2 + $0x60] sm:$0xff] }
  0x1a   :  { %v514_v33 = vpack.c.bf16 %v190_v29, %v189_v28  ;;  %v705_v34 = vld [vmem:[#allocation2 + $0x68] sm:$0xff]  ;;  %v708_v36 = vld [vmem:[#allocation2 + $0x70] sm:$0xff]  ;;  %v713_v38 = vld [vmem:[#allocation2 + $0x78] sm:$0xff] }
  0x1b   :  { %v72_v12 = vadd.f32 %v71_v10, %v657_v9  ;;  %512 = vmatpush3.bf16.xpose.msk.msra.mxu1 %vm682_vm2, %v510_v24  ;;  %v191_v39 = vld [vmem:[%s943_s2 + $0x20] sm:$0xff]  ;;  %v192_v40 = vld [vmem:[%s943_s2 + $0x28] sm:$0xff]  ;;  %v729_v47 = vld [vmem:[#allocation2 + $0x90] sm:$0xff] }
  0x1c   :  { %513 = vmatprep.subr.bf16.mxu1 %v605_v1  ;;  %v723_v42 = vld [vmem:[#allocation2 + $0x80] sm:$0xff]  ;;  %v518_v44 = vpack.c.bf16 %v192_v40, %v191_v39  ;;  %v726_v45 = vld [vmem:[#allocation2 + $0x88] sm:$0xff]  ;;  %v734_v49 = vld [vmem:[#allocation2 + $0x98] sm:$0xff] }
  0x1d   :  { %v73_v14 = vadd.f32 %v72_v12, %v660_v11  ;;  %v193_v50 = vld [vmem:[%s943_s2 + $0x30] sm:$0xff]  ;;  %v194_v51 = vld [vmem:[%s943_s2 + $0x38] sm:$0xff]  ;;  %v744_v53 = vld [vmem:[#allocation2 + $0xa0] sm:$0xff] }
  0x1e   :  { %v522_v55 = vpack.c.bf16 %v194_v51, %v193_v50  ;;  %v747_v56 = vld [vmem:[#allocation2 + $0xa8] sm:$0xff]  ;;  %v750_v58 = vld [vmem:[#allocation2 + $0xb0] sm:$0xff]  ;;  %v755_v60 = vld [vmem:[#allocation2 + $0xb8] sm:$0xff] }
  0x1f   :  { %v74_v16 = vadd.f32 %v73_v14, %v663_v13  ;;  %v195_v61 = vld [vmem:[%s943_s2 + $0x40] sm:$0xff]  ;;  %v196_v62 = vld [vmem:[%s943_s2 + $0x48] sm:$0xff]  ;;  %v771_v12 = vld [vmem:[#allocation2 + $0xd0] sm:$0xff] }
  0x20   :  { %v765_v0 = vld [vmem:[#allocation2 + $0xc0] sm:$0xff]  ;;  %v526_v6 = vpack.c.bf16 %v196_v62, %v195_v61  ;;  %v768_v8 = vld [vmem:[#allocation2 + $0xc8] sm:$0xff]  ;;  %v198_v19 = vld [vmem:[%s943_s2 + $0x58] sm:$0xff] }
  0x21   :  { %v75_v18 = vadd.f32 %v74_v16, %v666_v15  ;;  %v776_v16 = vld [vmem:[#allocation2 + $0xd8] sm:$0xff]  ;;  %v789_v28 = vld [vmem:[#allocation2 + $0xe8] sm:$0xff]  ;;  %v807_v40 = vld [vmem:[#allocation2 + $0x100] sm:$0xff] }
  0x22   :  { %v818_v51 = vld [vmem:[#allocation2 + $0x118] sm:$0xff]  ;;  %v831_v62 = vld [vmem:[#allocation2 + $0x128] sm:$0xff] }
  0x23   :  { %v76_v23 = vadd.f32 %v75_v18, %v669_v17  ;;  %516 = vmatpush3.bf16.xpose.msk.msra.mxu1 %vm682_vm2, %v514_v33  ;;  %v197_v18 = vld [vmem:[%s943_s2 + $0x50] sm:$0xff]  ;;  %v797_v33 = vld [vmem:[#allocation2 + $0xf8] sm:$0xff] }
  0x24   :  { %517 = vmatprep.subr.bf16.mxu1 %v605_v1 }
  0x25   :  { %v77_v26 = vadd.f32 %v76_v23, %v675_v20  ;;  %v786_v23 = vld [vmem:[#allocation2 + $0xe0] sm:$0xff] }
  0x27   :  { %v78_v30 = vadd.f32 %v77_v26, %v687_v25  ;;  %v530_v26 = vpack.c.bf16 %v198_v19, %v197_v18 }
  0x29   :  { %v79_v32 = vadd.f32 %v78_v30, %v692_v27  ;;  %v792_v30 = vld [vmem:[#allocation2 + $0xf0] sm:$0xff] }
  0x2b   :  { %v80_v35 = vadd.f32 %v79_v32, %v702_v31  ;;  %520 = vmatpush3.bf16.xpose.msk.msra.mxu1 %vm682_vm2, %v518_v44  ;;  %v810_v44 = vld [vmem:[#allocation2 + $0x108] sm:$0xff] }
  0x2c   :  { %521 = vmatprep.subr.bf16.mxu1 %v605_v1 }
  0x2d   :  { %v81_v37 = vadd.f32 %v80_v35, %v705_v34  ;;  %v199_v35 = vld [vmem:[%s943_s2 + $0x60] sm:$0xff] }
  0x2f   :  { %v82_v41 = vadd.f32 %v81_v37, %v708_v36  ;;  %v200_v37 = vld [vmem:[%s943_s2 + $0x68] sm:$0xff] }
  0x31   :  { %v83_v43 = vadd.f32 %v82_v41, %v713_v38 }
  0x33   :  { %v84_v46 = vadd.f32 %v83_v43, %v723_v42  ;;  %524 = vmatpush3.bf16.xpose.msk.msra.mxu1 %vm682_vm2, %v522_v55  ;;  %v534_v43 = vpack.c.bf16 %v200_v37, %v199_v35 }
  0x34   :  { %525 = vmatprep.subr.bf16.mxu1 %v605_v1 }
  0x35   :  { %v85_v48 = vadd.f32 %v84_v46, %v726_v45 }
  0x37   :  { %v86_v52 = vadd.f32 %v85_v48, %v729_v47  ;;  %v813_v48 = vld [vmem:[#allocation2 + $0x110] sm:$0xff] }
  0x39   :  { %v87_v54 = vadd.f32 %v86_v52, %v734_v49  ;;  %v201_v52 = vld [vmem:[%s943_s2 + $0x70] sm:$0xff] }
  0x3b   :  { %v88_v57 = vadd.f32 %v87_v54, %v744_v53  ;;  %528 = vmatpush3.bf16.xpose.msk.msra.mxu1 %vm682_vm2, %v526_v6  ;;  %v202_v54 = vld [vmem:[%s943_s2 + $0x78] sm:$0xff]  ;;  %s606_s2 = smov [#allocation5]  }
  0x3c   :  { %529 = vmatprep.subr.bf16.mxu1 %v605_v1  ;;  %v538_v61 = vpack.c.bf16 %v202_v54, %v201_v52  ;;  %v839_v6 = vld [vmem:[#allocation2 + $0x138] sm:$0xff]  ;;  %v331_v52 = vlaneseq  ;;  %s420_s4 = sshll.u32 %s606_s2, 4  ;;  %s421_s4 = int_to_ptr.vmem [resolvable:$true] %s420_s4 }
  0x3d   :  { %v89_v59 = vadd.f32 %v88_v57, %v747_v56  ;;  %v828_v57 = vld [vmem:[#allocation2 + $0x120] sm:$0xff]  ;;  %s574_s5 = scalar_lea.vmem %s421_s4, 5120  ;;  %p579_p9 = scmp.lt.s32.totalorder %s421_s4, %s421_s4 }
  0x3e   :  { %v332_v54 = vshrl.u32 %v331_v52, 7  ;;  %p575_p8 = scmp.ne.s32.totalorder %s421_s4, %s574_s5  ;;  %p580_p10 = scmp.lt.s32.totalorder %s574_s5, %s574_s5 }
  0x3f   :  { %v90_v63 = vadd.f32 %v89_v59, %v750_v58 }
  0x40   :  { %p581_p11 = por %p580_p10, %p579_p9 }
  0x41   :  { %v91_v2 = vadd.f32 %v90_v63, %v755_v60 }
  0x42   :  { %p582_p12 = pnand %p581_p11, %p575_p8 }
  0x43   :  { %v92_v10 = vadd.f32 %v91_v2, %v765_v0  ;;  %532 = vmatpush3.bf16.xpose.msk.msra.mxu1 %vm682_vm2, %v530_v26 }
  0x44   :  { %533 = vmatprep.subr.bf16.mxu1 %v605_v1 }
  0x45   :  { %v93_v14 = vadd.f32 %v92_v10, %v768_v8 }
  0x47   :  { %v94_v21 = vadd.f32 %v93_v14, %v771_v12 }
  0x49   :  { %v95_v24 = vadd.f32 %v94_v21, %v776_v16 }
  0x4b   :  { %v96_v29 = vadd.f32 %v95_v24, %v786_v23  ;;  %536 = vmatpush3.bf16.xpose.msk.msra.mxu1 %vm682_vm2, %v534_v43 }
  0x4c   :  { %537 = vmatprep.subr.bf16.mxu1 %v605_v1  ;;  %v834_v1 = vld [vmem:[#allocation2 + $0x130] sm:$0xff] }
  0x4d   :  { %v97_v32 = vadd.f32 %v96_v29, %v789_v28 }
  0x4f   :  { %v98_v39 = vadd.f32 %v97_v32, %v792_v30 }
  0x51   :  { %v99_v41 = vadd.f32 %v98_v39, %v797_v33 }
  0x53   :  { %v100_v46 = vadd.f32 %v99_v41, %v807_v40  ;;  %540 = vmatpush3.bf16.xpose.msk.msra.mxu1 %vm682_vm2, %v538_v61 }
  0x55   :  { %v101_v50 = vadd.f32 %v100_v46, %v810_v44 }
  0x57   :  { %v102_v55 = vadd.f32 %v101_v50, %v813_v48 }
  0x59   :  { %v103_v59 = vadd.f32 %v102_v55, %v818_v51  ;;  %v333_v55 = vsub.s32 0, %v332_v54 }
  0x5b   :  { %v104_v63 = vadd.f32 %v103_v59, %v828_v57 }
  0x5d   :  { %v105_v2 = vadd.f32 %v104_v63, %v831_v62 }
  0x5f   :  { %v106_v10 = vadd.f32 %v105_v2, %v834_v1 }
  0x61   :  { %v107_v14 = vadd.f32 %v106_v10, %v839_v6 }
  0x63   :  { %v108_v18 = vrot.slane %v107_v14, 4 }
  0x65   :  { %v109_v19 = vadd.f32 %v108_v18, %v107_v14 }
  0x67   :  { %v110_v21 = vrot.slane %v109_v19, 2 }
  0x69   :  { %v111_v24 = vadd.f32 %v110_v21, %v109_v19 }
  0x6b   :  { %v112_v26 = vrot.slane %v111_v24, 1 }
  0x6d   :  { %v113_v29 = vadd.f32 %v112_v26, %v111_v24 }
  0x6f   :  { %v114_v32 = vmul.f32 0.003125, %v113_v29 }
  0x71   :  { %472 = vmatmul.mubr.f32.vlgmr.msra.gmra.mrb[0].mxu0 %v114_v32 }
 0x144   :  { %v182_v35 = vpop.f32.mrb[0].mxu0 }
 0x145   :  { %v186_v37 = vmax.f32 %v182_v35, 0.0  ;;  %v473_v39 = vpop.f32.mrb[1].mxu0 }
 0x147   :  { %507 = vmatmul.mubr.msk.f32.vlgmr.msra.gmra.mrb[0].mxu1 %vm203_vm1, %v186_v37 }
 0x21a   :  { %v321_v22 = vpop.f32.mrb[0].mxu1 }
 0x21b   :  { %v449_v41 = vmul.f32 -1.442695, %v321_v22  ;;  %v508_v43 = vpop.f32.mrb[1].mxu1 }
 0x21d   :  { %548 = vpow2.f32 %v449_v41 }
 0x227   :  { %v549_v46 = vpop.eup %548 }
 0x228   :  { %v328_v50 = vadd.f32 1.0, %v549_v46 }
 0x22a   :  { %550 = vrcp.f32 %v328_v50 }
 0x234   :  { %v551_v59 = vpop.eup %550 }
 0x235   :  { %v844_v61 = vrot.slane %v551_v59, %v333_v55 }
 0x237   :  { %v335_v63 = vmul.f32 %v844_v61, %v646_v3  ;;  %v336_v2 = vmul.f32 %v844_v61, %v648_v4  ;;  %v337_v10 = vmul.f32 %v844_v61, %v650_v5  ;;  %v338_v14 = vmul.f32 %v844_v61, %v654_v7 }
 0x238   :  { %v339_v18 = vmul.f32 %v844_v61, %v657_v9  ;;  %v340_v19 = vmul.f32 %v844_v61, %v660_v11  ;;  %v341_v21 = vmul.f32 %v844_v61, %v663_v13  ;;  %v342_v3 = vmul.f32 %v844_v61, %v666_v15 }
 0x239   :  { %v343_v4 = vmul.f32 %v844_v61, %v669_v17  ;;  %v344_v5 = vmul.f32 %v844_v61, %v675_v20  ;;  %v345_v7 = vmul.f32 %v844_v61, %v687_v25  ;;  %v346_v9 = vmul.f32 %v844_v61, %v692_v27  ;;  %375 = vst [vmem:[#allocation5] sm:$0xff] %v335_v63 }
 0x23a   :  { %376 = vst [vmem:[#allocation5 + $0x8] sm:$0xff] %v336_v2  ;;  %377 = vst [vmem:[#allocation5 + $0x10] sm:$0xff] %v337_v10  ;;  %v347_v11 = vmul.f32 %v844_v61, %v702_v31  ;;  %v348_v13 = vmul.f32 %v844_v61, %v705_v34  ;;  %v349_v15 = vmul.f32 %v844_v61, %v708_v36 }
 0x23b   :  { %378 = vst [vmem:[#allocation5 + $0x18] sm:$0xff] %v338_v14  ;;  %v350_v17 = vmul.f32 %v844_v61, %v713_v38  ;;  %379 = vst [vmem:[#allocation5 + $0x20] sm:$0xff] %v339_v18  ;;  %v351_v20 = vmul.f32 %v844_v61, %v723_v42  ;;  %v352_v25 = vmul.f32 %v844_v61, %v726_v45 }
 0x23c   :  { %380 = vst [vmem:[#allocation5 + $0x28] sm:$0xff] %v340_v19  ;;  %381 = vst [vmem:[#allocation5 + $0x30] sm:$0xff] %v341_v21  ;;  %v353_v27 = vmul.f32 %v844_v61, %v729_v47  ;;  %v354_v31 = vmul.f32 %v844_v61, %v734_v49  ;;  %v355_v34 = vmul.f32 %v844_v61, %v744_v53 }
 0x23d   :  { %382 = vst [vmem:[#allocation5 + $0x38] sm:$0xff] %v342_v3  ;;  %383 = vst [vmem:[#allocation5 + $0x40] sm:$0xff] %v343_v4  ;;  %v356_v36 = vmul.f32 %v844_v61, %v747_v56  ;;  %v357_v38 = vmul.f32 %v844_v61, %v750_v58  ;;  %v358_v42 = vmul.f32 %v844_v61, %v755_v60 }
 0x23e   :  { %384 = vst [vmem:[#allocation5 + $0x48] sm:$0xff] %v344_v5  ;;  %385 = vst [vmem:[#allocation5 + $0x50] sm:$0xff] %v345_v7  ;;  %v359_v45 = vmul.f32 %v844_v61, %v765_v0  ;;  %v360_v47 = vmul.f32 %v844_v61, %v768_v8  ;;  %v361_v49 = vmul.f32 %v844_v61, %v771_v12 }
 0x23f   :  { %386 = vst [vmem:[#allocation5 + $0x58] sm:$0xff] %v346_v9  ;;  %387 = vst [vmem:[#allocation5 + $0x60] sm:$0xff] %v347_v11  ;;  %v362_v53 = vmul.f32 %v844_v61, %v776_v16  ;;  %v363_v56 = vmul.f32 %v844_v61, %v786_v23  ;;  %v364_v58 = vmul.f32 %v844_v61, %v789_v28 }
 0x240   :  { %388 = vst [vmem:[#allocation5 + $0x68] sm:$0xff] %v348_v13  ;;  %389 = vst [vmem:[#allocation5 + $0x70] sm:$0xff] %v349_v15  ;;  %v365_v60 = vmul.f32 %v844_v61, %v792_v30  ;;  %v366_v0 = vmul.f32 %v844_v61, %v797_v33  ;;  %v367_v8 = vmul.f32 %v844_v61, %v807_v40 }
 0x241   :  { %390 = vst [vmem:[#allocation5 + $0x78] sm:$0xff] %v350_v17  ;;  %391 = vst [vmem:[#allocation5 + $0x80] sm:$0xff] %v351_v20  ;;  %v368_v12 = vmul.f32 %v844_v61, %v810_v44  ;;  %v369_v16 = vmul.f32 %v844_v61, %v813_v48  ;;  %v370_v23 = vmul.f32 %v844_v61, %v818_v51 }
 0x242   :  { %392 = vst [vmem:[#allocation5 + $0x88] sm:$0xff] %v352_v25  ;;  %393 = vst [vmem:[#allocation5 + $0x90] sm:$0xff] %v353_v27  ;;  %v371_v28 = vmul.f32 %v844_v61, %v828_v57  ;;  %v372_v30 = vmul.f32 %v844_v61, %v831_v62  ;;  %v373_v33 = vmul.f32 %v844_v61, %v834_v1 }
 0x243   :  { %394 = vst [vmem:[#allocation5 + $0x98] sm:$0xff] %v354_v31  ;;  %395 = vst [vmem:[#allocation5 + $0xa0] sm:$0xff] %v355_v34  ;;  %v374_v40 = vmul.f32 %v844_v61, %v839_v6 }
 0x244   :  { %396 = vst [vmem:[#allocation5 + $0xa8] sm:$0xff] %v356_v36  ;;  %397 = vst [vmem:[#allocation5 + $0xb0] sm:$0xff] %v357_v38 }
 0x245   :  { %398 = vst [vmem:[#allocation5 + $0xb8] sm:$0xff] %v358_v42  ;;  %399 = vst [vmem:[#allocation5 + $0xc0] sm:$0xff] %v359_v45 }
 0x246   :  { %400 = vst [vmem:[#allocation5 + $0xc8] sm:$0xff] %v360_v47  ;;  %401 = vst [vmem:[#allocation5 + $0xd0] sm:$0xff] %v361_v49 }
 0x247   :  { %402 = vst [vmem:[#allocation5 + $0xd8] sm:$0xff] %v362_v53  ;;  %403 = vst [vmem:[#allocation5 + $0xe0] sm:$0xff] %v363_v56 }
 0x248   :  { %404 = vst [vmem:[#allocation5 + $0xe8] sm:$0xff] %v364_v58  ;;  %405 = vst [vmem:[#allocation5 + $0xf0] sm:$0xff] %v365_v60 }
 0x249   :  { %406 = vst [vmem:[#allocation5 + $0xf8] sm:$0xff] %v366_v0  ;;  %407 = vst [vmem:[#allocation5 + $0x100] sm:$0xff] %v367_v8 }
 0x24a   :  { %408 = vst [vmem:[#allocation5 + $0x108] sm:$0xff] %v368_v12  ;;  %409 = vst [vmem:[#allocation5 + $0x110] sm:$0xff] %v369_v16 }
 0x24b   :  { %410 = vst [vmem:[#allocation5 + $0x118] sm:$0xff] %v370_v23  ;;  %411 = vst [vmem:[#allocation5 + $0x120] sm:$0xff] %v371_v28 }
 0x24c   :  { %412 = vst [vmem:[#allocation5 + $0x128] sm:$0xff] %v372_v30  ;;  %413 = vst [vmem:[#allocation5 + $0x130] sm:$0xff] %v373_v33 }
 0x24d   :  { %414 = vst [vmem:[#allocation5 + $0x138] sm:$0xff] %v374_v40 }
 0x24e   :  { %585 = shalt.err (!%p582_p12)
}
 0x24f   :  { %s586_s8 = scalar_lea.hbm %s944_s3, 5120 }
 0x250   :  { %p587_p13 = scmp.ne.s32.totalorder %s944_s3, %s586_s8  ;;  %p590_p0 = scmp.lt.u32.totalorder %s586_s8, %s944_s3 }
 0x252   :  { %p592_p1 = pnand %p590_p0, %p587_p13 }
 0x254   :  { %595 = shalt.err (!%p592_p1)
}
 0x255   :  { %426 = dma.vmem_to_hbm [thread:$0]  %s421_s4, 5120, %s944_s3, [#allocation4], %s601_s22, %s601_s22, %s602_s23  }
 0x256   :  { %598 = dma.done.wait [#allocation4], 5120  }
 0x257   :  { %599 = vsyncadd [#allocation4], 4294962176 }
 0x258   :  { %430 = vsyncpa [#allocation3], 1 }
 0x259   :  { %431 = vsyncpa [#allocation4], 1 }

</bundles_post_ra>
